<compile_context>
chip_gen: v5e
topology: v5e:2x2
jax: 0.10.0
libtpu: 0.0.40
codegen_flags: <defaults>
</compile_context>

<pallas_src>
import functools
import math

import jax
import jax.numpy as jnp
from jax.experimental import pallas as pl
from jax.experimental.pallas import tpu as pltpu

_LOG_2PI = math.log(2.0 * math.pi)
_TARGET_STREAM_BYTES = 4 << 20          # aim for ~4 MiB tiles per big stream


def _round_up(x, m):
    return (x + m - 1) // m * m


def _vmem_config():
    """Generation-aware VMEM sizing: scoped limit ~= half of physical VMEM
    (64 MiB on 128-MiB v5e/v6e, 32 MiB on 64-MiB v7x); ~60% of it as the
    double-buffered tile budget.  Falls back to conservative v7x numbers when
    not running on a real TPU (e.g. interpret mode)."""
    phys = 64 << 20
    try:
        phys = int(pltpu.get_tpu_info().vmem_capacity_bytes)
    except Exception:
        pass
    limit = min(max(phys // 2, 32 << 20), 64 << 20)
    budget = (limit * 3) // 5
    return limit, budget


def _choose_tile_rows(n_rows, width, n_streams, budget_bytes, max_tile_rows=None):
    """Largest sublane tile (multiple of 8) that (a) targets multi-MiB per big
    stream to amortize the ~0.35us per-step overhead and (b) keeps the
    double-buffered working set of all tiled streams under the VMEM budget."""
    bytes_per_row = width * 4                                   # worst-case f32
    target = max(1, _TARGET_STREAM_BYTES // bytes_per_row)
    by_budget = max(1, budget_bytes // (2 * n_streams * bytes_per_row))
    tn = min(target, by_budget, _round_up(n_rows, 8))
    if max_tile_rows is not None:
        tn = min(tn, max(8, max_tile_rows))
    return max(8, _round_up(tn, 8))


def _prep_param(p, n, event_shape, d, pack, r, w):
    """Normalize mean/sigma to a 2-D kernel operand.

    Returns (array, is_per_feature).  Per-feature params become a tiny (1, W)
    tile that stays VMEM-resident for the whole grid; per-sample params are a
    zero-copy reshape of the caller's array (no broadcast / cast / pad)."""
    event_shape = tuple(event_shape)
    if p.shape == event_shape or p.shape == (1,) + event_shape:
        p2 = p.reshape(1, d)
        if pack > 1:
            p2 = jnp.tile(p2, (1, pack))        # (1, 128): negligible, resident
        return p2, True
    if p.shape == (n,) + event_shape:
        return p.reshape(r, w), False
    # Rare general-broadcast fallback.
    return jnp.broadcast_to(p, (n,) + event_shape).reshape(r, w), False


def _kernel(mean_ref, sigma_ref, eps_ref, z_ref, logp_ref, *,
            d_seg, pack, const, log_temp):
    # Casts happen here (inputs arrive at native dtype).
    mean = mean_ref[...].astype(jnp.float32)
    sigma = sigma_ref[...].astype(jnp.float32)   # (1, W) when per-feature
    if log_temp:                                  # static: temperature != None
        sigma = sigma + jnp.float32(log_temp)
    eps = eps_ref[...].astype(jnp.float32)

    scale = jnp.exp(sigma)                        # O(D) EUP work if per-feature
    z_ref[...] = (mean + scale * eps).astype(z_ref.dtype)   # lane-dense store

    term = sigma + 0.5 * eps * eps                # broadcasts over rows if (1, W)
    # Per-segment (per original sample) reduction over the folded lane layout.
    for g in range(pack):                         # static, pack = 128 // D (or 1)
        seg = term[:, g * d_seg:(g + 1) * d_seg]
        logp_ref[:, g:g + 1] = const - jnp.sum(seg, axis=-1, keepdims=True)


def diag_gaussian_cond_forward(mean, sigma, eps, *, log_temp=0.0,
                               max_tile_rows=None):
    """z = mean + exp(sigma + log_temp) * eps; log_p reduced over event dims.

    eps has shape (num_samples, *event_shape); mean/sigma are either per-sample
    (same shape as eps) or per-feature (event_shape / (1,)+event_shape).
    Returns (z[num_samples, *event_shape] in the caller's dtype, log_p[f32]).
    """
    mean = jnp.asarray(mean)
    sigma = jnp.asarray(sigma)
    eps = jnp.asarray(eps)

    n = eps.shape[0]
    event_shape = tuple(eps.shape[1:])
    d = math.prod(event_shape) if event_shape else 1
    out_dtype = jnp.result_type(mean.dtype, sigma.dtype, eps.dtype)

    # Lane folding: pack several samples into one 128-lane row when D < 128.
    if d < 128 and 128 % d == 0 and n % (128 // d) == 0:
        pack = 128 // d
    else:
        pack = 1
    w = pack * d
    r = n // pack

    eps2 = eps.reshape(r, w)                       # zero-copy contiguous reshape
    mean2, mean_pf = _prep_param(mean, n, event_shape, d, pack, r, w)
    sigma2, sigma_pf = _prep_param(sigma, n, event_shape, d, pack, r, w)

    n_streams = 2 + (0 if mean_pf else 1) + (0 if sigma_pf else 1)
    vmem_limit, vmem_budget = _vmem_config()
    tn = _choose_tile_rows(r, w, n_streams, vmem_budget, max_tile_rows)
    num_tiles = pl.cdiv(r, tn)                     # ragged tail -> partial block
    # NOTE: the tail tile relies on Pallas partial-block semantics: OOB reads
    # are padded, OOB writes are dropped, so no jnp.pad pre-pass is needed and
    # no out-of-range rows are written.

    row_map = lambda i: (i, 0)
    rep_map = lambda i: (0, 0)                     # stays VMEM-resident
    eps_spec = pl.BlockSpec((tn, w), row_map)
    mean_spec = pl.BlockSpec((1, w), rep_map) if mean_pf else pl.BlockSpec((tn, w), row_map)
    sigma_spec = pl.BlockSpec((1, w), rep_map) if sigma_pf else pl.BlockSpec((tn, w), row_map)

    z2, logp2 = pl.pallas_call(
        functools.partial(_kernel, d_seg=d, pack=pack,
                          const=-0.5 * d * _LOG_2PI, log_temp=float(log_temp)),
        out_shape=(
            jax.ShapeDtypeStruct((r, w), out_dtype),       # z in caller dtype
            jax.ShapeDtypeStruct((r, pack), jnp.float32),  # log_p kept in f32
        ),
        grid_spec=pltpu.PrefetchScalarGridSpec(
            num_scalar_prefetch=0,
            grid=(num_tiles,),
            in_specs=[mean_spec, sigma_spec, eps_spec],
            out_specs=(pl.BlockSpec((tn, w), row_map),
                       pl.BlockSpec((tn, pack), row_map)),
        ),
        compiler_params=pltpu.CompilerParams(
            dimension_semantics=("parallel",),
            vmem_limit_bytes=vmem_limit,
        ),
    )(mean2, sigma2, eps2)

    z = z2.reshape((n,) + event_shape)
    log_p = logp2.reshape(n)
    return z, log_p


class DiagGaussianCond:
    """Conditional diagonal Gaussian prior (mirrors the PyTorch module)."""

    def __init__(self, shape):
        if isinstance(shape, int):
            shape = (shape,)
        self.shape = tuple(shape)
        self.n_dim = len(self.shape)
        self.d = math.prod(self.shape)
        self.temperature = None

    def forward(self, mean, sigma, num_samples=1, *, key, max_tile_rows=None):
        # TODO(synk): torch.randn inside forward is reproduced with
        # jax.random.normal in the wrapper; the in-kernel TPU hardware PRNG
        # (pltpu.prng_seed / stateful_normal) has no CPU/interpret lowering.
        mean = jnp.asarray(mean)
        eps = jax.random.normal(key, (num_samples,) + self.shape, dtype=mean.dtype)
        log_temp = 0.0 if self.temperature is None else math.log(self.temperature)
        return diag_gaussian_cond_forward(mean, sigma, eps, log_temp=log_temp,
                                          max_tile_rows=max_tile_rows)


def diag_gaussian_cond_ref(mean, sigma, eps):
    """Pure-JAX reference (mirrors the PyTorch forward, temperature=None)."""
    d = math.prod(eps.shape[1:]) if eps.ndim > 1 else 1
    z = mean + jnp.exp(sigma) * eps
    axes = tuple(range(1, eps.ndim))
    log_p = -0.5 * d * _LOG_2PI - jnp.sum(sigma + 0.5 * eps ** 2, axis=axes)
    return z, log_p


if __name__ == "__main__":
    D = 32                                  # module spec: shape = (32,)
    key = jax.random.PRNGKey(0)
    k1, k2, k3, k4, k5, k6, k7, k8 = jax.random.split(key, 8)

    # (a) per-sample mean/sigma, lane-folded (4 samples per 128-lane row),
    #     multi-tile grid with a ragged tail (partial last block).
    n_a = 40
    mean_a = jax.random.normal(k1, (n_a, D), dtype=jnp.float32)
    sigma_a = 0.1 * jax.random.normal(k2, (n_a, D), dtype=jnp.float32)
    eps_a = jax.random.normal(k3, (n_a, D), dtype=jnp.float32)
    z_a, lp_a = diag_gaussian_cond_forward(mean_a, sigma_a, eps_a, max_tile_rows=8)
    jax.block_until_ready((z_a, lp_a))
    z_r, lp_r = diag_gaussian_cond_ref(mean_a, sigma_a, eps_a)
    assert z_a.shape == (n_a, D) and lp_a.shape == (n_a,)
    assert jnp.allclose(z_a, z_r, atol=1e-5, rtol=1e-5)
    assert jnp.allclose(lp_a, lp_r, atol=1e-4, rtol=1e-5)

    # (b) per-feature mean/sigma: (1, 128) tile stays VMEM-resident; only the
    #     eps and z streams hit HBM per grid step.
    n_b = 24
    mean_b = jax.random.normal(k4, (D,), dtype=jnp.float32)
    sigma_b = 0.1 * jax.random.normal(k5, (D,), dtype=jnp.float32)
    eps_b = jax.random.normal(k6, (n_b, D), dtype=jnp.float32)
    z_b, lp_b = diag_gaussian_cond_forward(mean_b, sigma_b, eps_b)
    jax.block_until_ready((z_b, lp_b))
    z_r, lp_r = diag_gaussian_cond_ref(mean_b, sigma_b, eps_b)
    assert z_b.shape == (n_b, D) and lp_b.shape == (n_b,)
    assert jnp.allclose(z_b, z_r, atol=1e-5, rtol=1e-5)
    assert jnp.allclose(lp_b, lp_r, atol=1e-4, rtol=1e-5)

    # (c) row count not divisible by the lane-fold factor -> unfolded fallback.
    n_c = 18
    eps_c = jax.random.normal(k7, (n_c, D), dtype=jnp.float32)
    z_c, lp_c = diag_gaussian_cond_forward(mean_b, sigma_b, eps_c)
    jax.block_until_ready((z_c, lp_c))
    z_r, lp_r = diag_gaussian_cond_ref(mean_b, sigma_b, eps_c)
    assert z_c.shape == (n_c, D) and lp_c.shape == (n_c,)
    assert jnp.allclose(z_c, z_r, atol=1e-5, rtol=1e-5)
    assert jnp.allclose(lp_c, lp_r, atol=1e-4, rtol=1e-5)

    # (d) module-style sampling path (eps drawn outside, kernel does the rest).
    prior = DiagGaussianCond(D)
    z_d, lp_d = prior.forward(mean_a, sigma_a, num_samples=n_a, key=k8,
                              max_tile_rows=8)
    jax.block_until_ready((z_d, lp_d))
    assert z_d.shape == (n_a, D) and lp_d.shape == (n_a,)
    eps_hat = (z_d - mean_a) * jnp.exp(-sigma_a)
    lp_chk = -0.5 * D * _LOG_2PI - jnp.sum(sigma_a + 0.5 * eps_hat ** 2, axis=1)
    assert jnp.allclose(lp_d, lp_chk, atol=1e-3, rtol=1e-4)
    assert abs(float(jnp.mean(eps_hat))) < 0.2
    assert abs(float(jnp.std(eps_hat)) - 1.0) < 0.2

    print("KERNEL_OK")
</pallas_src>

<mosaic_0001>
module attributes {stable_mosaic.version = 11 : i64} {
  func.func @_kernel(%arg0: i32, %arg1: memref<8x128xf32, #tpu.memory_space<vmem>>, %arg2: memref<8x128xf32, #tpu.memory_space<vmem>>, %arg3: memref<8x128xf32, #tpu.memory_space<vmem>>, %arg4: memref<8x128xf32, #tpu.memory_space<vmem>>, %arg5: memref<8x4xf32, #tpu.memory_space<vmem>>) attributes {dimension_semantics = [#tpu.dimension_semantics<parallel>], iteration_bounds = array<i64: 2>, scalar_prefetch = 0 : i64, scratch_operands = 0 : i64, tpu.core_type = #tpu.core_type<tc>, window_params = [{transform_indices = @transform_0, window_bounds = array<i64: 8, 128>}, {transform_indices = @transform_1, window_bounds = array<i64: 8, 128>}, {transform_indices = @transform_2, window_bounds = array<i64: 8, 128>}, {transform_indices = @transform_3, window_bounds = array<i64: 8, 128>}, {transform_indices = @transform_4, window_bounds = array<i64: 8, 4>}]} {
    %c0 = arith.constant 0 : index
    %c0_0 = arith.constant 0 : index
    %0 = vector.load %arg1[%c0, %c0_0] : memref<8x128xf32, #tpu.memory_space<vmem>>, vector<8x128xf32>
    %c0_1 = arith.constant 0 : index
    %c0_2 = arith.constant 0 : index
    %1 = vector.load %arg2[%c0_1, %c0_2] : memref<8x128xf32, #tpu.memory_space<vmem>>, vector<8x128xf32>
    %c0_3 = arith.constant 0 : index
    %c0_4 = arith.constant 0 : index
    %2 = vector.load %arg3[%c0_3, %c0_4] : memref<8x128xf32, #tpu.memory_space<vmem>>, vector<8x128xf32>
    %3 = math.exp %1 : vector<8x128xf32>
    %4 = arith.mulf %3, %2 : vector<8x128xf32>
    %5 = arith.addf %0, %4 : vector<8x128xf32>
    %c0_5 = arith.constant 0 : index
    %c0_6 = arith.constant 0 : index
    %6 = vector.load %arg4[%c0_5, %c0_6] : memref<8x128xf32, #tpu.memory_space<vmem>>, vector<8x128xf32>
    tpu.vector_store %arg4[%c0_5, %c0_6], %5 {strides = array<i32>} : memref<8x128xf32, #tpu.memory_space<vmem>>, vector<8x128xf32>,
    %cst = arith.constant 5.000000e-01 : f32
    %7 = vector.broadcast %cst : f32 to vector<8x128xf32>
    %8 = arith.mulf %7, %2 : vector<8x128xf32>
    %9 = arith.mulf %8, %2 : vector<8x128xf32>
    %10 = arith.addf %1, %9 : vector<8x128xf32>
    %11 = vector.extract_strided_slice %10 {offsets = [0, 0], sizes = [8, 32], strides = [1, 1]} : vector<8x128xf32> to vector<8x32xf32>
    %cst_7 = arith.constant dense<0.000000e+00> : vector<8xf32>
    %12 = vector.multi_reduction <add>, %11, %cst_7 [1] : vector<8x32xf32> to vector<8xf32>
    %13 = vector.shape_cast %12 : vector<8xf32> to vector<8x1xf32>
    %cst_8 = arith.constant -29.4060326 : f32
    %14 = vector.broadcast %cst_8 : f32 to vector<8x1xf32>
    %15 = arith.subf %14, %13 : vector<8x1xf32>
    %c0_9 = arith.constant 0 : index
    %c0_10 = arith.constant 0 : index
    %16 = vector.load %arg5[%c0_9, %c0_10] : memref<8x4xf32, #tpu.memory_space<vmem>>, vector<8x1xf32>
    tpu.vector_store %arg5[%c0_9, %c0_10], %15 {strides = array<i32>} : memref<8x4xf32, #tpu.memory_space<vmem>>, vector<8x1xf32>,
    %17 = vector.extract_strided_slice %10 {offsets = [0, 32], sizes = [8, 32], strides = [1, 1]} : vector<8x128xf32> to vector<8x32xf32>
    %cst_11 = arith.constant dense<0.000000e+00> : vector<8xf32>
    %18 = vector.multi_reduction <add>, %17, %cst_11 [1] : vector<8x32xf32> to vector<8xf32>
    %19 = vector.shape_cast %18 : vector<8xf32> to vector<8x1xf32>
    %cst_12 = arith.constant -29.4060326 : f32
    %20 = vector.broadcast %cst_12 : f32 to vector<8x1xf32>
    %21 = arith.subf %20, %19 : vector<8x1xf32>
    %c0_13 = arith.constant 0 : index
    %c1 = arith.constant 1 : index
    %22 = vector.load %arg5[%c0_13, %c1] : memref<8x4xf32, #tpu.memory_space<vmem>>, vector<8x1xf32>
    tpu.vector_store %arg5[%c0_13, %c1], %21 {strides = array<i32>} : memref<8x4xf32, #tpu.memory_space<vmem>>, vector<8x1xf32>,
    %23 = vector.extract_strided_slice %10 {offsets = [0, 64], sizes = [8, 32], strides = [1, 1]} : vector<8x128xf32> to vector<8x32xf32>
    %cst_14 = arith.constant dense<0.000000e+00> : vector<8xf32>
    %24 = vector.multi_reduction <add>, %23, %cst_14 [1] : vector<8x32xf32> to vector<8xf32>
    %25 = vector.shape_cast %24 : vector<8xf32> to vector<8x1xf32>
    %cst_15 = arith.constant -29.4060326 : f32
    %26 = vector.broadcast %cst_15 : f32 to vector<8x1xf32>
    %27 = arith.subf %26, %25 : vector<8x1xf32>
    %c0_16 = arith.constant 0 : index
    %c2 = arith.constant 2 : index
    %28 = vector.load %arg5[%c0_16, %c2] : memref<8x4xf32, #tpu.memory_space<vmem>>, vector<8x1xf32>
    tpu.vector_store %arg5[%c0_16, %c2], %27 {strides = array<i32>} : memref<8x4xf32, #tpu.memory_space<vmem>>, vector<8x1xf32>,
    %29 = vector.extract_strided_slice %10 {offsets = [0, 96], sizes = [8, 32], strides = [1, 1]} : vector<8x128xf32> to vector<8x32xf32>
    %cst_17 = arith.constant dense<0.000000e+00> : vector<8xf32>
    %30 = vector.multi_reduction <add>, %29, %cst_17 [1] : vector<8x32xf32> to vector<8xf32>
    %31 = vector.shape_cast %30 : vector<8xf32> to vector<8x1xf32>
    %cst_18 = arith.constant -29.4060326 : f32
    %32 = vector.broadcast %cst_18 : f32 to vector<8x1xf32>
    %33 = arith.subf %32, %31 : vector<8x1xf32>
    %c0_19 = arith.constant 0 : index
    %c3 = arith.constant 3 : index
    %34 = vector.load %arg5[%c0_19, %c3] : memref<8x4xf32, #tpu.memory_space<vmem>>, vector<8x1xf32>
    tpu.vector_store %arg5[%c0_19, %c3], %33 {strides = array<i32>} : memref<8x4xf32, #tpu.memory_space<vmem>>, vector<8x1xf32>,
    return
  }
  func.func @transform_0(%arg0: i32) -> (i32, i32) {
    %c0_i32 = arith.constant 0 : i32
    %c0_i32_0 = arith.constant 0 : i32
    return %arg0, %c0_i32 : i32, i32
  }
  func.func @transform_1(%arg0: i32) -> (i32, i32) {
    %c0_i32 = arith.constant 0 : i32
    %c0_i32_0 = arith.constant 0 : i32
    return %arg0, %c0_i32 : i32, i32
  }
  func.func @transform_2(%arg0: i32) -> (i32, i32) {
    %c0_i32 = arith.constant 0 : i32
    %c0_i32_0 = arith.constant 0 : i32
    return %arg0, %c0_i32 : i32, i32
  }
  func.func @transform_3(%arg0: i32) -> (i32, i32) {
    %c0_i32 = arith.constant 0 : i32
    %c0_i32_0 = arith.constant 0 : i32
    return %arg0, %c0_i32 : i32, i32
  }
  func.func @transform_4(%arg0: i32) -> (i32, i32) {
    %c0_i32 = arith.constant 0 : i32
    %c0_i32_0 = arith.constant 0 : i32
    return %arg0, %c0_i32 : i32, i32
  }
}

</mosaic_0001>

<bundles_post_ra>
// kernel: tpu_custom_call.1
= control target key start
LH: loop header
LB: loop body
LE: loop exit
PB: predicated region body
PF: predicated region fallthrough
CT: control target
= control target key end

     0   :  { %s976_s0 = inlined_call_operand.hbm [shape: f32[10,128], index: 0, kind: input, shape index: {}]   ;;  %s977_s1 = inlined_call_operand.hbm [shape: f32[10,128], index: 1, kind: input, shape index: {}]   ;;  %s978_s2 = inlined_call_operand.hbm [shape: f32[10,128], index: 2, kind: input, shape index: {}]   ;;  %s979_s3 = inlined_call_operand.hbm [shape: f32[10,128], index: 3, kind: output, shape index: {0}]   ;;  %s980_s4 = inlined_call_operand.vmem [shape: f32[10,4], index: 4, kind: output, shape index: {1}]  }
   0x1   :  { %982 = sst [smem:[#allocation14_spill]] %s977_s1 }
   0x2   :  { %10 = vsyncpa [#allocation3], 0 }
   0x3   :  { %12 = vsyncpa [#allocation3 + $0x1], 0 }
   0x4   :  { %13 = vsyncpa [#allocation6], 0 }
   0x5   :  { %15 = vsyncpa [#allocation6 + $0x1], 0 }
   0x6   :  { %16 = vsyncpa [#allocation4], 0 }
   0x7   :  { %18 = vsyncpa [#allocation4 + $0x1], 0  ;;  %s777_s15 = smov 0   ;;  %s779_s16 = smov 0  }
   0x8   :  { %s781_s17 = smov 0   ;;  %s783_s18 = smov 0  }
   0x9 LB: > { %983 = sst [smem:[#allocation12_spill]] %s743_s17  ;;  %s798_s19 = sadd.s32 4294967295, %s747_s18   ;;  %s747_s18 = sphi %s783_s18, %s995_s18   ;;  %s743_s17 = sphi %s781_s17, %s992_s17   ;;  %s739_s16 = sphi %s779_s16, %s994_s16   ;;  %s735_s15 = sphi %s777_s15, %s993_s15  }
   0xa   : > { %s507_s20 = sadd.s32 4294967294, %s747_s18   ;;  %s802_s21 = sadd.s32 1, %s747_s18  }
   0xb   : > { %s31_s22 = sadd.s32 1, %s743_s17  ;;  %s28_s23 = ssub.s32 %s747_s18, %s802_s21 }
   0xc   : > { %p38_p0 = scmp.ne.s32.totalorder %s743_s17, %s739_s16  ;;  %p29_p1 = scmp.eq.s32.totalorder %s28_s23, 0 }
   0xd   : > { %p39_p2 = scmp.eq.s32.totalorder %s747_s18, 0  ;;  %p44_p3 = scmp.ne.s32.totalorder %s739_s16, %s735_s15 }
   0xe   : > { %p45_p4 = scmp.eq.s32.totalorder %s798_s19, 0  ;;  %p120_p7 = scmp.eq.s32.totalorder %s798_s19, 1 }
   0xf   : > { %s814_s24 = scalar_select %p29_p1, %s743_s17, %s31_s22  }
  0x10   : > { %p40_p5 = por %p39_p2, %p38_p0  ;;  %p816_p6 = por %p45_p4, %p44_p3 }
  0x11   : > { %984 = sst [smem:[#allocation13_spill]] %s814_s24  ;;  %p126_p8 = scmp.eq.s32.totalorder %s507_s20, 1 }
  0x12   : > { %p509_p9 = scmp.ge.s32.totalorder %s747_s18, 2  ;;  %p548_p10 = scmp.lt.s32.totalorder %s747_s18, 2 }
  0x13   : > { %p823_p11 = por %p120_p7, %p38_p0  ;;  %p827_p12 = por %p126_p8, %p44_p3 }
  0x14   : > { %s172_s28 = sand.u32 1, %s743_s17   ;;  %s833_s29 = sshll.u32 %s747_s18, 3 }
  0x15   : > { %s837_s30 = sshll.u32 %s172_s28, 3  ;;  %p839_p13 = pnand %p548_p10, %p40_p5 }
  0x16   : > { %s191_s6 = sand.u32 1, %s747_s18   ;;  %s989_s1 = sld [smem:[#allocation14_spill]] }
  0x17   : > { %s195_s10 = scalar_lea.vmem [#allocation5], %s837_s30  ;;  %p516_p0 = scmp.ge.s32.totalorder %s747_s18, 1 }
  0x18   : > { %s203_s11 = sshll.u32 %s195_s10, 4  ;;  %s850_s13 = scalar_lea.sflag [#allocation6], %s191_s6  ;;  %s204_s11 = int_to_ptr.vmem [resolvable:$true] %s203_s11 }
  0x19   : > { %p591_p2 = pneg %p839_p13 }
  0x1c   : > { %s199_s9 = scalar_lea.hbm %s989_s1, %s833_s29  ;;  %s594_s7 = scalar_lea.hbm %s989_s1, 16 }
  0x1d   : > { %s201_s12 = sshll.u32 %s199_s9, 4  ;;  %s202_s12 = int_to_ptr.hbm [resolvable:$true] %s201_s12 }
  0x1e   : > { %s587_s14 = sshra.s32 %s202_s12, 4  ;;  %s588_s14 = int_to_ptr.hbm [resolvable:$true] %s587_s14 }
  0x1f   : > { %s589_s20 = scalar_lea.hbm %s588_s14, 8  ;;  %p595_p5 = scmp.lt.s32.totalorder %s588_s14, %s989_s1 }
  0x20   : > { %p590_p1 = scmp.ne.s32.totalorder %s588_s14, %s589_s20  ;;  %p596_p7 = scmp.lt.s32.totalorder %s594_s7, %s589_s20 }
  0x22   : > { %p592_p3 = pnand %p591_p2, %p590_p1  ;;  %p597_p8 = por %p596_p7, %p595_p5 }
  0x24   : > { %p593_p4 = pneg %p592_p3 }
  0x26   : > { %p598_p10 = pnand %p597_p8, %p593_p4 }
  0x28   : > { %601 = shalt.err (!%p598_p10)
}
  0x29   : > { %540 = dma.hbm_to_vmem [thread:$0]  (!%p839_p13), %s202_s12, 128, %s204_s11, %s850_s13  }
  0x2a   : > { %p227_p1 = scmp.lt.s32.totalorder %s747_s18, 3  ;;  %s180_s22 = scalar_lea.hbm %s976_s0, %s833_s29 }
  0x2b   : > { %s182_s20 = sshll.u32 %s180_s22, 4  ;;  %s176_s23 = scalar_lea.vmem [#allocation2], %s837_s30  ;;  %s183_s20 = int_to_ptr.hbm [resolvable:$true] %s182_s20 }
  0x2c   : > { %p873_p3 = pnand %p516_p0, %p227_p1  ;;  %s184_s7 = sshll.u32 %s176_s23, 4  ;;  %s185_s7 = int_to_ptr.vmem [resolvable:$true] %s184_s7 }
  0x2d   : > { %s173_s8 = scalar_lea.sflag [#allocation3], %s172_s28  ;;  %s617_s9 = sshra.s32 %s183_s20, 4  ;;  %s618_s9 = int_to_ptr.hbm [resolvable:$true] %s617_s9 }
  0x2e   : > { %s619_s11 = scalar_lea.hbm %s618_s9, 8  ;;  %s624_s10 = scalar_lea.hbm %s976_s0, 16 }
  0x2f   : > { %p620_p4 = scmp.ne.s32.totalorder %s618_s9, %s619_s11  ;;  %p625_p0 = scmp.lt.s32.totalorder %s618_s9, %s976_s0 }
  0x30   : > { %p626_p8 = scmp.lt.s32.totalorder %s624_s10, %s619_s11 }
  0x31   : > { %p622_p5 = pnand %p620_p4, %p591_p2 }
  0x32   : > { %p627_p10 = por %p626_p8, %p625_p0 }
  0x33   : > { %p623_p7 = pneg %p622_p5 }
  0x35   : > { %p628_p1 = pnand %p627_p10, %p623_p7 }
  0x37   : > { %631 = shalt.err (!%p628_p1)
}
  0x38   : > { %537 = dma.hbm_to_vmem [thread:$0]  (!%p839_p13), %s183_s20, 128, %s185_s7, %s173_s8  }
  0x39   : > { %s218_s24 = scalar_lea.hbm %s978_s2, %s833_s29  ;;  %s214_s12 = scalar_lea.vmem [#allocation7], %s837_s30 }
  0x3a   : > { %s222_s6 = sshll.u32 %s214_s12, 4  ;;  %s220_s17 = sshll.u32 %s218_s24, 4  ;;  %s223_s6 = int_to_ptr.vmem [resolvable:$true] %s222_s6  ;;  %s221_s17 = int_to_ptr.hbm [resolvable:$true] %s220_s17 }
  0x3b   : > { %s647_s1 = sshra.s32 %s221_s17, 4  ;;  %s654_s20 = scalar_lea.hbm %s978_s2, 16  ;;  %s648_s1 = int_to_ptr.hbm [resolvable:$true] %s647_s1 }
  0x3c   : > { %s649_s9 = scalar_lea.hbm %s648_s1, 8  ;;  %p655_p0 = scmp.lt.s32.totalorder %s648_s1, %s978_s2 }
  0x3d   : > { %p650_p4 = scmp.ne.s32.totalorder %s648_s1, %s649_s9  ;;  %p656_p8 = scmp.lt.s32.totalorder %s654_s20, %s649_s9 }
  0x3f   : > { %p652_p5 = pnand %p650_p4, %p591_p2  ;;  %p657_p10 = por %p656_p8, %p655_p0 }
  0x41   : > { %p653_p7 = pneg %p652_p5 }
  0x43   : > { %p658_p1 = pnand %p657_p10, %p653_p7 }
  0x45   : > { %661 = shalt.err (!%p658_p1)
}
  0x46   : > { %543 = dma.hbm_to_vmem [thread:$0]  (!%p839_p13), %s221_s17, 128, %s223_s6, %s850_s13  }
  0x47   : > { %231 = sbr.rel (%p873_p3) target bundleno = 332 (0x14c), region = 32  ;;  %s911_s24 = sand.u32 (!%p873_p3), 1, %s739_s16  }
  0x48   : > { %s914_s29 = sshll.u32 (!%p873_p3), %s911_s24, 3  ;;  %s234_s30 = scalar_lea.sflag (!%p873_p3), [#allocation3], %s911_s24 }
  0x49   : > { %s237_s22 = scalar_lea.vmem (!%p873_p3), [#allocation2], %s914_s29 }
  0x4c   : > { %722 = dma.done.wait (%p816_p6), %s234_s30, 128  }
  0x4d   : > { %724 = vsyncadd (%p816_p6), %s234_s30, 4294967168  ;;  %s243_s17 = sand.u32 1, %s798_s19   ;;  %s247_s13 = scalar_lea.vmem [#allocation5], %s914_s29 }
  0x4e   : > { %s244_s5 = scalar_lea.sflag [#allocation6], %s243_s17 }
  0x4f   : > { %726 = dma.done.wait (%p816_p6), %s244_s5, 256  }
  0x50   : > { %728 = vsyncadd (%p816_p6), %s244_s5, 4294967040  ;;  %s257_s14 = scalar_lea.vmem [#allocation7], %s914_s29  ;;  %v302_v2 = vld [vmem:[%s247_s13] sm:$0xff]  ;;  %s749_s28 = smov 96   ;;  %vm312_vm0 = vcmask 261120   ;;  %vm317_vm1 = vcmask 7168  }
  0x51   : > { %v303_v0 = vld [vmem:[%s257_s14] sm:$0xff]  ;;  %s750_s23 = smov 32   ;;  %s751_s12 = smov 64   ;;  %v304_v12 = vmul.f32 1.442695, %v302_v2 }
  0x52   : > { %v309_v1 = vmul.f32 0.5, %v303_v0  ;;  %p297_p6 = scmp.lt.s32.totalorder %s798_s19, 1  ;;  %s523_s10 = sshll.u32 %s798_s19, 3  ;;  %v301_v17 = vld [vmem:[%s237_s22] sm:$0xff] }
  0x53   : > { %585 = vpow2.f32 %v304_v12  ;;  %s362_s8 = scalar_lea.hbm %s979_s3, %s523_s10  ;;  %s290_s30 = scalar_lea.vmem [#allocation8], %s914_s29 }
  0x54   : > { %v310_v3 = vmul.f32 %v309_v1, %v303_v0  ;;  %s298_s25 = scalar_select %p297_p6, %s798_s19, 1 }
  0x55   : > { %s364_s17 = sshll.u32 %s290_s30, 4  ;;  %s366_s5 = sshll.u32 %s362_s8, 4  ;;  %s365_s17 = int_to_ptr.vmem [resolvable:$true] %s364_s17  ;;  %s367_s5 = int_to_ptr.hbm [resolvable:$true] %s366_s5 }
  0x56   : > { %v311_v4 = vadd.f32 %v310_v3, %v302_v2  ;;  %s521_s6 = sshll.u32 %s298_s25, 3  ;;  %s348_s13 = scalar_lea.sflag [#allocation4], %s911_s24 }
  0x57   : > { %s934_s11 = scalar_lea.vmem %s980_s4, %s521_s6  ;;  %s691_s14 = sshra.s32 %s367_s5, 4  ;;  %s692_s14 = int_to_ptr.hbm [resolvable:$true] %s691_s14 }
  0x58   : > { %320 = vrot.lane.b32.xlu0 %v311_v4, %s749_s28  ;;  %338 = vrot.lane.b32.xlu1 %v311_v4, %s750_s23  ;;  %v313_v5 = vsel %vm312_vm0, %v311_v4, 0.0  ;;  %s693_s19 = scalar_lea.hbm %s692_s14, 8  ;;  %p698_p4 = scmp.lt.s32.totalorder %s692_s14, %s979_s3 }
  0x59   : > { %v586_v15 = vpop.eup %585  ;;  %p694_p13 = scmp.ne.s32.totalorder %s692_s14, %s693_s19 }
  0x5a   : > { %v306_v16 = vmul.f32 %v586_v15, %v303_v0 }
  0x5b   : > { %p695_p2 = pnand %p694_p13, %p823_p11 }
  0x5c   : > { %v307_v18 = vadd.f32 %v306_v16, %v301_v17 }
  0x5d   : > { %p696_p3 = pneg %p695_p2 }
  0x5e   : > { %308 = vst [vmem:[%s290_s30] sm:$0xff] %v307_v18 }
  0x60   : > { %329 = vrot.lane.b32.xlu0 %v311_v4, %s751_s12  ;;  %s697_s12 = scalar_lea.hbm %s979_s3, 16 }
  0x61   : > { %p699_p5 = scmp.lt.s32.totalorder %s697_s12, %s693_s19 }
  0x63   : > { %p700_p7 = por %p699_p5, %p698_p4 }
  0x65   : > { %p701_p0 = pnand %p700_p7, %p696_p3 }
  0x82   : > { %314 = vadd.xlane.f32.xlu1 %v313_v5 }
  0xca   : > { %v321_v6 = vpop.permute.xlu0 %320  ;;  %v339_v7 = vpop.permute.xlu1 %338 }
  0xcb   : > { %v323_v8 = vsel %vm312_vm0, %v321_v6, 0.0  ;;  %v341_v9 = vsel %vm312_vm0, %v339_v7, 0.0 }
  0xcc   : > { %324 = vadd.xlane.f32.xlu2 %v323_v8  ;;  %342 = vadd.xlane.f32.xlu0 %v341_v9 }
  0xd2   : > { %v330_v10 = vpop.permute.xlu0 %329 }
  0xd3   : > { %v332_v11 = vsel %vm312_vm0, %v330_v10, 0.0 }
  0xd4   : > { %333 = vadd.xlane.f32.xlu2 %v332_v11 }
  0xf5   : > { %v315_v13 = vpop.xlane.xlu1 %314 }
  0xf6   : > { %v316_v14 = vsub.f32 -29.406033, %v315_v13 }
  0xf8   : > { %318 = vst.msk [vmem:[%s934_s11] sm:$0xff] %vm317_vm1, %v316_v14 }
  0xf9   : > { %704 = shalt.err (!%p701_p0)
}
  0xfa   : > { %532 = dma.vmem_to_hbm [thread:$0]  (%p823_p11), %s365_s17, 128, %s367_s5, %s348_s13   ;;  %vm327_vm2 = vcmask 15368   ;;  %vm336_vm3 = vcmask 23568   ;;  %vm345_vm4 = vcmask 31768  }
 0x13f   : > { %v325_v19 = vpop.xlane.xlu2 %324  ;;  %v343_v21 = vpop.xlane.xlu0 %342 }
 0x140   : > { %v326_v20 = vsub.f32 -29.406033, %v325_v19  ;;  %v344_v23 = vsub.f32 -29.406033, %v343_v21 }
 0x142   : > { %328 = vst.msk [vmem:[%s934_s11] sm:$0xff] %vm327_vm2, %v326_v20 }
 0x147   : > { %v334_v22 = vpop.xlane.xlu2 %333 }
 0x148   : > { %v335_v24 = vsub.f32 -29.406033, %v334_v22 }
 0x14a   : > { %337 = vst.msk [vmem:[%s934_s11] sm:$0xff] %vm336_vm3, %v335_v24 }
 0x14b   : > { %346 = vst.msk [vmem:[%s934_s11] sm:$0xff] %vm345_vm4, %v344_v23 }
 0x14c PF: > { %s381_s26 = sand.u32 1, %s735_s15   ;;  %p545_p11 = pnand %p509_p9, %p827_p12 }
 0x14d   : > { %s382_s24 = scalar_lea.sflag [#allocation4], %s381_s26 }
 0x14e   : > { %p546_p8 = pneg %p545_p11 }
 0x150   : > { %730 = dma.done.wait (%p546_p8), %s382_s24, 128  }
 0x151   : > { %732 = vsyncadd (%p546_p8), %s382_s24, 4294967168  ;;  %s991_s29 = sld [smem:[#allocation12_spill]]  ;;  %p21_p10 = scmp.ge.s32.totalorder %s802_s21, 4  }
 0x152   : > { %s992_s17 = sld [smem:[#allocation13_spill]]  ;;  %s993_s15 = smov %s739_s16 }
 0x153   : > { %s995_s18 = smov %s802_s21  ;;  %23 = sbr.rel (!%p21_p10) target bundleno = 9 (0x9), region = 113 }
 0x157   : > { %s994_s16 = smov %s991_s29 }
 0x158   :  { %395 = vsyncpa [#allocation3], 1 }
 0x159   :  { %397 = vsyncpa [#allocation3 + $0x1], 1 }
 0x15a   :  { %398 = vsyncpa [#allocation6], 1 }
 0x15b   :  { %400 = vsyncpa [#allocation6 + $0x1], 1 }
 0x15c   :  { %401 = vsyncpa [#allocation4], 1 }
 0x15d   :  { %403 = vsyncpa [#allocation4 + $0x1], 1 }

</bundles_post_ra>
